<compile_context>
chip_gen: v7x
topology: tpu7x:2x2x1
jax: 0.10.0
libtpu: 0.0.40
codegen_flags: <defaults>
</compile_context>

<pallas_src>
import jax
import jax.numpy as jnp
from jax import lax
from jax.experimental import pallas as pl
from jax.experimental.pallas import tpu as pltpu

_LANE = 128
_EPS = 1e-07


def _round_up(x, m):
    return ((x + m - 1) // m) * m


def _make_tce_kernel(row_tile, n_elems, chunk, needs_mask):
    """Build the per-block kernel (static config baked in via closure)."""

    def kernel(y_ref, t_ref, sum_ref, cnt_ref):
        y = y_ref[...].astype(jnp.float32)
        t = t_ref[...].astype(jnp.float32)

        # torch.where(y == 1, 1 - 1e-7, y); torch.where(y == -1, -1 + 1e-7, y)
        y = jnp.where(y == 1.0, 1.0 - _EPS, y)
        y = jnp.where(y == -1.0, -1.0 + _EPS, y)

        wp = (1.0 + t) * 0.5
        wn = (1.0 - t) * 0.5
        loss = wp * jnp.log((1.0 + y) * 0.5) + wn * jnp.log((1.0 - y) * 0.5)

        # torch mask reduces to "loss is finite" (neither inf nor nan).
        finite = jnp.logical_and(loss == loss, jnp.abs(loss) != jnp.inf)

        if needs_mask:
            # Exclude lane padding / out-of-bounds block overhang: element k
            # of block i is valid iff i*chunk + k < n_elems.
            i = pl.program_id(0)
            row_iota = lax.broadcasted_iota(jnp.int32, (row_tile, _LANE), 0)
            lane_iota = lax.broadcasted_iota(jnp.int32, (row_tile, _LANE), 1)
            local_idx = row_iota * _LANE + lane_iota
            remaining = n_elems - i * chunk
            finite = jnp.logical_and(finite, local_idx < remaining)

        masked = jnp.where(finite, loss, 0.0)
        mask_f = finite.astype(jnp.float32)

        # Fold sublane groups within the block: (row_tile, 128) -> (8, 128).
        # Pure VPU vreg adds; the single cross-lane reduce happens outside
        # the kernel on the tiny (num_blocks, 8, 128) partials.
        partial_sum = masked.reshape(row_tile // 8, 8, _LANE).sum(axis=0)
        partial_cnt = mask_f.reshape(row_tile // 8, 8, _LANE).sum(axis=0)

        sum_ref[...] = partial_sum.reshape(1, 8, _LANE)
        cnt_ref[...] = partial_cnt.reshape(1, 8, _LANE)

    return kernel


def tce_loss(y, target, *, row_tile=1024):
    """Pallas implementation of TCE_loss.forward(y, target) -> scalar."""
    assert y.shape == target.shape, (y.shape, target.shape)
    n = int(y.size)

    # sublane granularity depends on dtype packing (f32: 8, bf16/f16: 16, ...)
    itemsize = jnp.dtype(y.dtype).itemsize
    sub = {4: 8, 2: 16, 1: 32}.get(itemsize, 8)
    pad_unit = sub * _LANE

    y_f = y.reshape(-1)
    t_f = target.reshape(-1)

    padded = _round_up(n, pad_unit)
    if padded != n:
        # Ragged case only: pad with zeros; the in-kernel validity mask
        # excludes these elements exactly (values don't matter).
        y_f = jnp.pad(y_f, (0, padded - n))
        t_f = jnp.pad(t_f, (0, padded - n))

    rows = padded // _LANE
    y2 = y_f.reshape(rows, _LANE)
    t2 = t_f.reshape(rows, _LANE)

    # Large tile to amortize per-step pipeline overhead (sweepable).
    rt = max(sub, min(_round_up(row_tile, sub), rows))
    rt = _round_up(rt, sub)
    num_blocks = pl.cdiv(rows, rt)
    chunk = rt * _LANE
    needs_mask = (num_blocks * chunk != n)

    kernel = _make_tce_kernel(rt, n, chunk, needs_mask)

    out_bytes = 2 * num_blocks * 8 * _LANE * 4
    cost = pl.CostEstimate(
        flops=16 * n,
        transcendentals=2 * n,
        bytes_accessed=2 * n * itemsize + out_bytes,
    )

    sums, cnts = pl.pallas_call(
        kernel,
        out_shape=(
            jax.ShapeDtypeStruct((num_blocks, 8, _LANE), jnp.float32),
            jax.ShapeDtypeStruct((num_blocks, 8, _LANE), jnp.float32),
        ),
        grid_spec=pltpu.PrefetchScalarGridSpec(
            num_scalar_prefetch=0,
            grid=(num_blocks,),
            in_specs=[
                pl.BlockSpec((rt, _LANE), lambda i: (i, 0)),
                pl.BlockSpec((rt, _LANE), lambda i: (i, 0)),
            ],
            out_specs=[
                pl.BlockSpec((1, 8, _LANE), lambda i: (i, 0, 0)),
                pl.BlockSpec((1, 8, _LANE), lambda i: (i, 0, 0)),
            ],
        ),
        compiler_params=pltpu.CompilerParams(
            dimension_semantics=("parallel",)),
        cost_estimate=cost,
    )(y2, t2)

    # Final tiny cross-lane reduction + divide in plain JAX.
    # (all-non-finite input -> 0/0 -> NaN, same as the reference.)
    return -jnp.sum(sums) / jnp.sum(cnts)


def _tce_loss_ref(y, target):
    """Pure-JAX reference matching the PyTorch module."""
    y = y.astype(jnp.float32)
    t = target.astype(jnp.float32)
    y = jnp.where(y == 1.0, 1.0 - _EPS, y)
    y = jnp.where(y == -1.0, -1.0 + _EPS, y)
    loss = (1.0 + t) / 2.0 * jnp.log((1.0 + y) / 2.0) \
         + (1.0 - t) / 2.0 * jnp.log((1.0 - y) / 2.0)
    mask = jnp.isfinite(loss)
    return -jnp.sum(jnp.where(mask, loss, 0.0)) / jnp.sum(mask.astype(jnp.float32))


if __name__ == "__main__":
    key = jax.random.PRNGKey(0)
    ky, kt = jax.random.split(key)

    # NCHW-style input, purely elementwise loss
    shape = (2, 4, 16, 16)
    y = jnp.tanh(jax.random.normal(ky, shape, dtype=jnp.float32))
    # targets in {-1, +1}, as implied by the (1 +/- target)/2 weighting
    target = jnp.sign(jax.random.normal(kt, shape, dtype=jnp.float32))
    target = jnp.where(target == 0.0, 1.0, target)

    # exercise the y == +-1 clamps and the NaN masking path
    y = y.at[0, 0, 0, 0].set(1.0)
    y = y.at[0, 0, 0, 1].set(-1.0)
    y = y.at[1, 3, 15, 15].set(1.5)  # produces NaN loss -> masked out

    result = tce_loss(y, target)
    jax.block_until_ready(result)
    ref = _tce_loss_ref(y, target)
    assert jnp.allclose(result, ref, rtol=1e-5, atol=1e-6), (result, ref)

    # ragged shape -> exercises the in-kernel tail validity mask
    shape2 = (2, 3, 7, 11)
    k2y, k2t = jax.random.split(kt)
    y_r = jnp.tanh(jax.random.normal(k2y, shape2, dtype=jnp.float32))
    t_r = jnp.sign(jax.random.normal(k2t, shape2, dtype=jnp.float32))
    t_r = jnp.where(t_r == 0.0, 1.0, t_r)
    result2 = tce_loss(y_r, t_r)
    jax.block_until_ready(result2)
    ref2 = _tce_loss_ref(y_r, t_r)
    assert jnp.allclose(result2, ref2, rtol=1e-5, atol=1e-6), (result2, ref2)

    print("KERNEL_OK")
</pallas_src>

<mosaic_0001>
module attributes {stable_mosaic.version = 11 : i64} {
  func.func @kernel(%arg0: i32, %arg1: memref<16x128xf32, #tpu.memory_space<vmem>>, %arg2: memref<16x128xf32, #tpu.memory_space<vmem>>, %arg3: memref<1x8x128xf32, #tpu.memory_space<vmem>>, %arg4: memref<1x8x128xf32, #tpu.memory_space<vmem>>) attributes {dimension_semantics = [#tpu.dimension_semantics<parallel>], iteration_bounds = array<i64: 1>, scalar_prefetch = 0 : i64, scratch_operands = 0 : i64, tpu.core_type = #tpu.core_type<tc>, window_params = [{transform_indices = @transform_0, window_bounds = array<i64: 16, 128>}, {transform_indices = @transform_1, window_bounds = array<i64: 16, 128>}, {transform_indices = @transform_2, window_bounds = array<i64: 1, 8, 128>}, {transform_indices = @transform_3, window_bounds = array<i64: 1, 8, 128>}]} {
    %c0 = arith.constant 0 : index
    %c0_0 = arith.constant 0 : index
    %0 = vector.load %arg1[%c0, %c0_0] : memref<16x128xf32, #tpu.memory_space<vmem>>, vector<16x128xf32>
    %c0_1 = arith.constant 0 : index
    %c0_2 = arith.constant 0 : index
    %1 = vector.load %arg2[%c0_1, %c0_2] : memref<16x128xf32, #tpu.memory_space<vmem>>, vector<16x128xf32>
    %cst = arith.constant 1.000000e+00 : f32
    %2 = vector.broadcast %cst : f32 to vector<16x128xf32>
    %3 = arith.cmpf oeq, %0, %2 : vector<16x128xf32>
    %cst_3 = arith.constant 0.99999988 : f32
    %4 = vector.broadcast %cst_3 : f32 to vector<16x128xf32>
    %5 = arith.select %3, %4, %0 : vector<16x128xi1>, vector<16x128xf32>
    %cst_4 = arith.constant -1.000000e+00 : f32
    %6 = vector.broadcast %cst_4 : f32 to vector<16x128xf32>
    %7 = arith.cmpf oeq, %5, %6 : vector<16x128xf32>
    %cst_5 = arith.constant -0.99999988 : f32
    %8 = vector.broadcast %cst_5 : f32 to vector<16x128xf32>
    %9 = arith.select %7, %8, %5 : vector<16x128xi1>, vector<16x128xf32>
    %cst_6 = arith.constant 1.000000e+00 : f32
    %10 = vector.broadcast %cst_6 : f32 to vector<16x128xf32>
    %11 = arith.addf %10, %1 : vector<16x128xf32>
    %cst_7 = arith.constant 5.000000e-01 : f32
    %12 = vector.broadcast %cst_7 : f32 to vector<16x128xf32>
    %13 = arith.mulf %11, %12 : vector<16x128xf32>
    %cst_8 = arith.constant 1.000000e+00 : f32
    %14 = vector.broadcast %cst_8 : f32 to vector<16x128xf32>
    %15 = arith.subf %14, %1 : vector<16x128xf32>
    %cst_9 = arith.constant 5.000000e-01 : f32
    %16 = vector.broadcast %cst_9 : f32 to vector<16x128xf32>
    %17 = arith.mulf %15, %16 : vector<16x128xf32>
    %cst_10 = arith.constant 1.000000e+00 : f32
    %18 = vector.broadcast %cst_10 : f32 to vector<16x128xf32>
    %19 = arith.addf %18, %9 : vector<16x128xf32>
    %cst_11 = arith.constant 5.000000e-01 : f32
    %20 = vector.broadcast %cst_11 : f32 to vector<16x128xf32>
    %21 = arith.mulf %19, %20 : vector<16x128xf32>
    %22 = math.log %21 : vector<16x128xf32>
    %23 = arith.mulf %13, %22 : vector<16x128xf32>
    %cst_12 = arith.constant 1.000000e+00 : f32
    %24 = vector.broadcast %cst_12 : f32 to vector<16x128xf32>
    %25 = arith.subf %24, %9 : vector<16x128xf32>
    %cst_13 = arith.constant 5.000000e-01 : f32
    %26 = vector.broadcast %cst_13 : f32 to vector<16x128xf32>
    %27 = arith.mulf %25, %26 : vector<16x128xf32>
    %28 = math.log %27 : vector<16x128xf32>
    %29 = arith.mulf %17, %28 : vector<16x128xf32>
    %30 = arith.addf %23, %29 : vector<16x128xf32>
    %31 = arith.cmpf oeq, %30, %30 : vector<16x128xf32>
    %32 = math.absf %30 : vector<16x128xf32>
    %cst_14 = arith.constant 0x7F800000 : f32
    %33 = vector.broadcast %cst_14 : f32 to vector<16x128xf32>
    %34 = arith.cmpf one, %32, %33 : vector<16x128xf32>
    %35 = arith.andi %31, %34 : vector<16x128xi1>
    %cst_15 = arith.constant 0.000000e+00 : f32
    %36 = vector.broadcast %cst_15 : f32 to vector<16x128xf32>
    %37 = arith.select %35, %30, %36 : vector<16x128xi1>, vector<16x128xf32>
    %38 = arith.extui %35 : vector<16x128xi1> to vector<16x128xi32>
    %39 = arith.sitofp %38 : vector<16x128xi32> to vector<16x128xf32>
    %40 = vector.shape_cast %37 : vector<16x128xf32> to vector<2x8x128xf32>
    %cst_16 = arith.constant dense<0.000000e+00> : vector<8x128xf32>
    %41 = vector.multi_reduction <add>, %40, %cst_16 [0] : vector<2x8x128xf32> to vector<8x128xf32>
    %42 = vector.shape_cast %39 : vector<16x128xf32> to vector<2x8x128xf32>
    %cst_17 = arith.constant dense<0.000000e+00> : vector<8x128xf32>
    %43 = vector.multi_reduction <add>, %42, %cst_17 [0] : vector<2x8x128xf32> to vector<8x128xf32>
    %44 = vector.shape_cast %41 : vector<8x128xf32> to vector<1x8x128xf32>
    %c0_18 = arith.constant 0 : index
    %c0_19 = arith.constant 0 : index
    %c0_20 = arith.constant 0 : index
    %45 = vector.load %arg3[%c0_18, %c0_19, %c0_20] : memref<1x8x128xf32, #tpu.memory_space<vmem>>, vector<1x8x128xf32>
    tpu.vector_store %arg3[%c0_18, %c0_19, %c0_20], %44 {strides = array<i32>} : memref<1x8x128xf32, #tpu.memory_space<vmem>>, vector<1x8x128xf32>,
    %46 = vector.shape_cast %43 : vector<8x128xf32> to vector<1x8x128xf32>
    %c0_21 = arith.constant 0 : index
    %c0_22 = arith.constant 0 : index
    %c0_23 = arith.constant 0 : index
    %47 = vector.load %arg4[%c0_21, %c0_22, %c0_23] : memref<1x8x128xf32, #tpu.memory_space<vmem>>, vector<1x8x128xf32>
    tpu.vector_store %arg4[%c0_21, %c0_22, %c0_23], %46 {strides = array<i32>} : memref<1x8x128xf32, #tpu.memory_space<vmem>>, vector<1x8x128xf32>,
    return
  }
  func.func @transform_0(%arg0: i32) -> (i32, i32) {
    %c0_i32 = arith.constant 0 : i32
    %c0_i32_0 = arith.constant 0 : i32
    return %arg0, %c0_i32 : i32, i32
  }
  func.func @transform_1(%arg0: i32) -> (i32, i32) {
    %c0_i32 = arith.constant 0 : i32
    %c0_i32_0 = arith.constant 0 : i32
    return %arg0, %c0_i32 : i32, i32
  }
  func.func @transform_2(%arg0: i32) -> (i32, i32, i32) {
    %c0_i32 = arith.constant 0 : i32
    %c0_i32_0 = arith.constant 0 : i32
    %c0_i32_1 = arith.constant 0 : i32
    return %arg0, %c0_i32, %c0_i32_0 : i32, i32, i32
  }
  func.func @transform_3(%arg0: i32) -> (i32, i32, i32) {
    %c0_i32 = arith.constant 0 : i32
    %c0_i32_0 = arith.constant 0 : i32
    %c0_i32_1 = arith.constant 0 : i32
    return %arg0, %c0_i32, %c0_i32_0 : i32, i32, i32
  }
}

</mosaic_0001>

<bundles_post_ra>
// kernel: tpu_custom_call.1
= control target key start
LH: loop header
LB: loop body
LE: loop exit
PB: predicated region body
PF: predicated region fallthrough
CT: control target
= control target key end

     0   :  { %9 = vsyncpa [#allocation3], 0  ;;  %s321_s0 = inlined_call_operand.hbm [shape: f32[16,128], index: 0, kind: input, shape index: {}]   ;;  %s322_s1 = inlined_call_operand.hbm [shape: f32[16,128], index: 1, kind: input, shape index: {}]   ;;  %s323_s2 = inlined_call_operand.hbm [shape: f32[1,8,128], index: 2, kind: output, shape index: {0}]   ;;  %s324_s3 = inlined_call_operand.hbm [shape: f32[1,8,128], index: 3, kind: output, shape index: {1}]  }
   0x1   :  { %10 = vsyncpa [#allocation6], 0 }
   0x2   :  { %11 = vsyncpa [#allocation4], 0 }
   0x3   :  { %12 = vsyncpa [#allocation9], 0  ;;  %s246_s12 = smov [#allocation2]   ;;  %s150_s16 = scalar_lea.hbm %s321_s0, 256 }
   0x4   :  { %s18_s13 = sshll.u32 %s246_s12, 4  ;;  %p151_p0 = scmp.ne.s32.totalorder %s321_s0, %s150_s16  ;;  %s19_s13 = int_to_ptr.vmem [resolvable:$true] %s18_s13 }
   0x5   :  { %p154_p1 = scmp.lt.u32.totalorder %s150_s16, %s321_s0 }
   0x7   :  { %p156_p2 = pnand %p154_p1, %p151_p0 }
   0x9   :  { %159 = shalt.err (!%p156_p2)
}
   0xa   :  { %s160_s21 = scalar_lea.vmem %s19_s13, 256  ;;  %p165_p4 = scmp.lt.s32.totalorder %s19_s13, %s19_s13 }
   0xb   :  { %p161_p3 = scmp.ne.s32.totalorder %s19_s13, %s160_s21  ;;  %p166_p5 = scmp.lt.s32.totalorder %s160_s21, %s160_s21 }
   0xd   :  { %p167_p6 = por %p166_p5, %p165_p4 }
   0xf   :  { %p168_p7 = pnand %p167_p6, %p161_p3 }
  0x11   :  { %171 = shalt.err (!%p168_p7)
}
  0x12   :  { %s247_s22 = smov 128   ;;  %s248_s23 = smov 8  }
  0x13   :  { %24 = dma.hbm_to_vmem [thread:$0]  %s321_s0, 256, %s19_s13, [#allocation3], %s247_s22, %s247_s22, %s248_s23  }
  0x14   :  { %s249_s26 = smov [#allocation5]   ;;  %s172_s30 = scalar_lea.hbm %s322_s1, 256 }
  0x15   :  { %s30_s27 = sshll.u32 %s249_s26, 4  ;;  %p173_p8 = scmp.ne.s32.totalorder %s322_s1, %s172_s30  ;;  %s31_s27 = int_to_ptr.vmem [resolvable:$true] %s30_s27 }
  0x16   :  { %p176_p9 = scmp.lt.u32.totalorder %s172_s30, %s322_s1 }
  0x18   :  { %p178_p10 = pnand %p176_p9, %p173_p8 }
  0x1a   :  { %181 = shalt.err (!%p178_p10)
}
  0x1b   :  { %s182_s8 = scalar_lea.vmem %s31_s27, 256  ;;  %p187_p12 = scmp.lt.s32.totalorder %s31_s27, %s31_s27 }
  0x1c   :  { %p183_p11 = scmp.ne.s32.totalorder %s31_s27, %s182_s8  ;;  %p188_p13 = scmp.lt.s32.totalorder %s182_s8, %s182_s8 }
  0x1e   :  { %p189_p0 = por %p188_p13, %p187_p12 }
  0x20   :  { %p190_p1 = pnand %p189_p0, %p183_p11 }
  0x22   :  { %193 = shalt.err (!%p190_p1)
}
  0x23   :  { %36 = dma.hbm_to_vmem [thread:$0]  %s322_s1, 256, %s31_s27, [#allocation6], %s247_s22, %s247_s22, %s248_s23  }
  0x24   :  { %238 = dma.done.wait [#allocation3], 256  }
  0x25   :  { %239 = vsyncadd [#allocation3], 4294967040 }
  0x26   :  { %240 = dma.done.wait [#allocation6], 256  }
  0x27   :  { %241 = vsyncadd [#allocation6], 4294967040  ;;  %v43_v0 = vld [vmem:[#allocation2] sm:$0xff]  ;;  %v44_v1 = vld [vmem:[#allocation2 + $0x8] sm:$0xff]  ;;  %s250_s1 = smov [#allocation7]   ;;  %v251_v41 = vmov 0.0  }
  0x28   :  { %vm47_vm0 = vcmp.eq.f32.partialorder %v43_v0, 1.0  ;;  %vm48_vm1 = vcmp.eq.f32.partialorder %v44_v1, 1.0  ;;  %v45_v14 = vld [vmem:[#allocation5] sm:$0xff]  ;;  %v46_v15 = vld [vmem:[#allocation5 + $0x8] sm:$0xff]  ;;  %s109_s10 = sshll.u32 %s250_s1, 4  ;;  %s252_s11 = smov [#allocation8]   ;;  %s110_s10 = int_to_ptr.vmem [resolvable:$true] %s109_s10 }
  0x29   :  { %v49_v2 = vsel %vm47_vm0, 0.9999999, %v43_v0  ;;  %v50_v3 = vsel %vm48_vm1, 0.9999999, %v44_v1  ;;  %v55_v16 = vadd.f32 1.0, %v45_v14  ;;  %v56_v17 = vadd.f32 1.0, %v46_v15  ;;  %p199_p3 = scmp.lt.s32.totalorder %s110_s10, %s110_s10 }
  0x2a   :  { %vm51_vm2 = vcmp.eq.f32.partialorder %v49_v2, -1.0  ;;  %vm52_vm3 = vcmp.eq.f32.partialorder %v50_v3, -1.0  ;;  %v59_v18 = vsub.f32 1.0, %v45_v14  ;;  %v60_v19 = vsub.f32 1.0, %v46_v15  ;;  %s119_s12 = sshll.u32 %s252_s11, 4  ;;  %s194_s13 = scalar_lea.vmem %s110_s10, 128  ;;  %s120_s12 = int_to_ptr.vmem [resolvable:$true] %s119_s12 }
  0x2b   :  { %v53_v4 = vsel %vm51_vm2, -0.9999999, %v49_v2  ;;  %v54_v5 = vsel %vm52_vm3, -0.9999999, %v50_v3  ;;  %v57_v20 = vmul.f32 0.5, %v55_v16  ;;  %v58_v22 = vmul.f32 0.5, %v56_v17  ;;  %p195_p2 = scmp.ne.s32.totalorder %s110_s10, %s194_s13  ;;  %p200_p4 = scmp.lt.s32.totalorder %s194_s13, %s194_s13 }
  0x2c   :  { %v63_v6 = vadd.f32 1.0, %v53_v4  ;;  %v64_v7 = vadd.f32 1.0, %v54_v5  ;;  %v73_v8 = vsub.f32 1.0, %v53_v4  ;;  %v74_v9 = vsub.f32 1.0, %v54_v5 }
  0x2d   :  { %v61_v24 = vmul.f32 0.5, %v59_v18  ;;  %v62_v27 = vmul.f32 0.5, %v60_v19  ;;  %p201_p5 = por %p200_p4, %p199_p3 }
  0x2e   :  { %v65_v10 = vmul.f32 0.5, %v63_v6  ;;  %v66_v11 = vmul.f32 0.5, %v64_v7  ;;  %v75_v12 = vmul.f32 0.5, %v73_v8  ;;  %v76_v13 = vmul.f32 0.5, %v74_v9 }
  0x2f   :  { %p202_p6 = pnand %p201_p5, %p195_p2 }
  0x30   :  { %142 = vlog2.f32 %v65_v10 }
  0x31   :  { %144 = vlog2.f32 %v66_v11 }
  0x32   :  { %146 = vlog2.f32 %v75_v12 }
  0x33   :  { %148 = vlog2.f32 %v76_v13 }
  0x3a   :  { %v143_v21 = vpop.eup %142 }
  0x3b   :  { %v145_v23 = vpop.eup %144  ;;  %v68_v25 = vmul.f32 0.6931472, %v143_v21 }
  0x3c   :  { %v147_v26 = vpop.eup %146  ;;  %v70_v28 = vmul.f32 0.6931472, %v145_v23 }
  0x3d   :  { %v149_v29 = vpop.eup %148  ;;  %v71_v30 = vmul.f32 %v68_v25, %v57_v20  ;;  %v78_v31 = vmul.f32 0.6931472, %v147_v26 }
  0x3e   :  { %v72_v32 = vmul.f32 %v70_v28, %v58_v22  ;;  %v80_v33 = vmul.f32 0.6931472, %v149_v29 }
  0x3f   :  { %v81_v34 = vmul.f32 %v78_v31, %v61_v24 }
  0x40   :  { %v82_v35 = vmul.f32 %v80_v33, %v62_v27 }
  0x41   :  { %v83_v36 = vadd.f32 %v81_v34, %v71_v30 }
  0x42   :  { %v84_v37 = vadd.f32 %v82_v35, %v72_v32 }
  0x43   :  { %vm85_vm4 = vcmp.eq.f32.partialorder %v83_v36, %v83_v36  ;;  %v87_v38 = vand.u32 2147483647, %v83_v36 }
  0x44   :  { %vm86_vm5 = vcmp.eq.f32.partialorder %v84_v37, %v84_v37  ;;  %v88_v39 = vand.u32 2147483647, %v84_v37 }
  0x45   :  { %vm89_vm6 = vcmp.ne.f32.partialorder %v87_v38, inf }
  0x46   :  { %vm90_vm7 = vcmp.ne.f32.partialorder %v88_v39, inf  ;;  %vm91_vm8 = vmand %vm85_vm4, %vm89_vm6 }
  0x47   :  { %vm92_vm9 = vmand %vm86_vm5, %vm90_vm7  ;;  %v93_v40 = vsel %vm91_vm8, %v83_v36, 0.0  ;;  %v133_v42 = vsel %vm91_vm8, 1.0, %v251_v41 }
  0x48   :  { %v94_v43 = vsel %vm92_vm9, %v84_v37, 0.0  ;;  %v134_v44 = vsel %vm92_vm9, 1.0, %v251_v41 }
  0x49   :  { %v99_v45 = vadd.f32 %v94_v43, %v93_v40  ;;  %v100_v46 = vadd.f32 %v134_v44, %v133_v42 }
  0x4b   :  { %101 = vst [vmem:[#allocation7] sm:$0xff] %v99_v45  ;;  %102 = vst [vmem:[#allocation8] sm:$0xff] %v100_v46 }
  0x4c   :  { %205 = shalt.err (!%p202_p6)
}
  0x4d   :  { %s206_s16 = scalar_lea.hbm %s323_s2, 128 }
  0x4e   :  { %p207_p7 = scmp.ne.s32.totalorder %s323_s2, %s206_s16  ;;  %p210_p8 = scmp.lt.u32.totalorder %s206_s16, %s323_s2 }
  0x50   :  { %p212_p9 = pnand %p210_p8, %p207_p7 }
  0x52   :  { %215 = shalt.err (!%p212_p9)
}
  0x53   :  { %112 = dma.vmem_to_hbm [thread:$0]  %s110_s10, 128, %s323_s2, [#allocation4]  }
  0x54   :  { %s216_s23 = scalar_lea.vmem %s120_s12, 128  ;;  %p221_p11 = scmp.lt.s32.totalorder %s120_s12, %s120_s12 }
  0x55   :  { %p217_p10 = scmp.ne.s32.totalorder %s120_s12, %s216_s23  ;;  %p222_p12 = scmp.lt.s32.totalorder %s216_s23, %s216_s23 }
  0x57   :  { %p223_p13 = por %p222_p12, %p221_p11 }
  0x59   :  { %p224_p0 = pnand %p223_p13, %p217_p10 }
  0x5b   :  { %227 = shalt.err (!%p224_p0)
}
  0x5c   :  { %s228_s26 = scalar_lea.hbm %s324_s3, 128 }
  0x5d   :  { %p229_p1 = scmp.ne.s32.totalorder %s324_s3, %s228_s26  ;;  %p232_p2 = scmp.lt.u32.totalorder %s228_s26, %s324_s3 }
  0x5f   :  { %p234_p3 = pnand %p232_p2, %p229_p1 }
  0x61   :  { %237 = shalt.err (!%p234_p3)
}
  0x62   :  { %122 = dma.vmem_to_hbm [thread:$0]  %s120_s12, 128, %s324_s3, [#allocation9]  }
  0x63   :  { %242 = dma.done.wait [#allocation4], 128  }
  0x64   :  { %243 = vsyncadd [#allocation4], 4294967168 }
  0x65   :  { %244 = dma.done.wait [#allocation9], 128  }
  0x66   :  { %245 = vsyncadd [#allocation9], 4294967168 }
  0x67   :  { %129 = vsyncpa [#allocation3], 1 }
  0x68   :  { %130 = vsyncpa [#allocation6], 1 }
  0x69   :  { %131 = vsyncpa [#allocation4], 1 }
  0x6a   :  { %132 = vsyncpa [#allocation9], 1 }

</bundles_post_ra>
